<compile_context>
chip_gen: v5e
topology: v5e:2x2
jax: 0.10.0
libtpu: 0.0.40
codegen_flags: <defaults>
</compile_context>

<pallas_src>
import functools

import jax
import jax.numpy as jnp
import numpy as np
from jax import lax
from jax.experimental import pallas as pl
from jax.experimental.pallas import tpu as pltpu


# ----------------------------- Pallas kernel --------------------------------
def cbam_kernel(x_ref, w1_ref, b1_ref, w2_ref, b2_ref, kmat_ref, shift_ref,
                o_ref):
    x = x_ref[...]                                   # (BT, C, HW) f32
    BT, C, HW = x.shape

    # ---------------- ChannelGate ----------------
    avg = jnp.sum(x, axis=2) * (1.0 / float(HW))     # (BT, C)
    mx = jnp.max(x, axis=2)                          # (BT, C)
    pooled = jnp.concatenate([avg, mx], axis=0)      # (2*BT, C) -> one MLP pass

    h = jnp.dot(pooled, w1_ref[...],
                preferred_element_type=jnp.float32) + b1_ref[...]
    h = jnp.maximum(h, 0.0)
    att2 = jnp.dot(h, w2_ref[...],
                   preferred_element_type=jnp.float32) + b2_ref[...]  # (2*BT, C)
    att = att2[:BT] + att2[BT:]                      # avg-branch + max-branch
    c_scale = jax.nn.sigmoid(att)                    # (BT, C)
    xg = x * c_scale[:, :, None]                     # channel-gated x

    # ---------------- SpatialGate ----------------
    cmax = jnp.max(xg, axis=1)                       # (BT, HW) ChannelPool max
    cmean = jnp.sum(xg, axis=1) * (1.0 / float(C))   # (BT, HW) ChannelPool mean
    pooled_sp = jnp.concatenate([cmax, cmean], axis=1)        # (BT, 2*HW)

    # 7x7 conv (2 -> 1 ch) + folded BN as one dense MXU matmul.
    conv = jnp.dot(pooled_sp, kmat_ref[...],
                   preferred_element_type=jnp.float32) + shift_ref[0]  # (BT, HW)
    s_scale = jax.nn.sigmoid(conv)                   # (BT, HW)
    o_ref[...] = xg * s_scale[:, None, :]            # (BT, C, HW)


# ------------------------------- wrapper -------------------------------------
@functools.partial(jax.jit, static_argnames=("batch_tile",))
def cbam_pallas(x, w1, b1, w2, b2, kmat, shift, *, batch_tile=None):
    B, C, H, W = x.shape
    HW = H * W
    Ch = w1.shape[1]

    if batch_tile is None:
        # At most 2 grid steps: feeds both v7x TensorCores while keeping the
        # per-step overhead negligible on single-TC v5e/v6e.
        batch_tile = B // 2 if (B % 2 == 0 and B >= 2) else 1
    assert B % batch_tile == 0
    grid = (B // batch_tile,)

    x_flat = x.reshape(B, C, HW)                     # lane-dense layout

    out = pl.pallas_call(
        cbam_kernel,
        out_shape=jax.ShapeDtypeStruct((B, C, HW), jnp.float32),
        grid=grid,
        in_specs=[
            pl.BlockSpec((batch_tile, C, HW), lambda b: (b, 0, 0)),
            pl.BlockSpec((C, Ch), lambda b: (0, 0)),
            pl.BlockSpec((1, Ch), lambda b: (0, 0)),
            pl.BlockSpec((Ch, C), lambda b: (0, 0)),
            pl.BlockSpec((1, C), lambda b: (0, 0)),
            pl.BlockSpec((2 * HW, HW), lambda b: (0, 0)),
            pl.BlockSpec((1,), lambda b: (0,),
                         memory_space=pltpu.MemorySpace.SMEM),
        ],
        out_specs=pl.BlockSpec((batch_tile, C, HW), lambda b: (b, 0, 0)),
        compiler_params=pltpu.CompilerParams(
            dimension_semantics=("parallel",)),
    )(x_flat, w1, b1, w2, b2, kmat, shift)

    return out.reshape(B, C, H, W)


# --------------- host-side folding of conv7x7 + BatchNorm --------------------
def build_conv_matrix(w_conv, bn_scale, H, W):
    """Fold the 2->1 channel 7x7 'same' conv (with BN scale) into a dense
    (2*H*W, H*W) matrix K so that conv_out_flat = [cmax | cmean] @ K."""
    w = np.asarray(w_conv, dtype=np.float64) * float(bn_scale)   # (2, 7, 7)
    K = np.zeros((2, H, W, H, W), dtype=np.float64)
    for c in range(2):
        for i in range(H):            # output row
            for j in range(W):        # output col
                for kh in range(7):
                    a = i + kh - 3
                    if a < 0 or a >= H:
                        continue
                    for kw in range(7):
                        b = j + kw - 3
                        if b < 0 or b >= W:
                            continue
                        K[c, a, b, i, j] += w[c, kh, kw]
    return jnp.asarray(K.reshape(2 * H * W, H * W), dtype=jnp.float32)


# --------------------------- pure-JAX reference -------------------------------
def cbam_reference(x, w1, b1, w2, b2, w_conv, gamma, beta, rm, rv, eps=1e-5):
    # ChannelGate
    avg = x.mean(axis=(2, 3))
    mx = x.max(axis=(2, 3))
    mlp = lambda p: jnp.maximum(p @ w1 + b1, 0.0) @ w2 + b2
    c_scale = jax.nn.sigmoid(mlp(avg) + mlp(mx))[:, :, None, None]
    xg = x * c_scale
    # SpatialGate
    comp = jnp.stack([xg.max(axis=1), xg.mean(axis=1)], axis=1)   # (B,2,H,W)
    conv = lax.conv_general_dilated(
        comp, w_conv[None], window_strides=(1, 1),
        padding=[(3, 3), (3, 3)],
        dimension_numbers=("NCHW", "OIHW", "NCHW"))
    bn = (conv - rm) / jnp.sqrt(rv + eps) * gamma + beta
    return xg * jax.nn.sigmoid(bn)


# --------------------------------- main ---------------------------------------
if __name__ == "__main__":
    B, C, H, W = 2, 32, 16, 16
    reduction_ratio = 16
    Ch = C // reduction_ratio                      # hidden width of the MLP

    key = jax.random.PRNGKey(0)
    kx, k1, k2, k3, k4, k5 = jax.random.split(key, 6)

    x = jax.random.normal(kx, (B, C, H, W), dtype=jnp.float32)

    # ChannelGate MLP parameters (Linear(C, Ch) -> ReLU -> Linear(Ch, C)).
    w1 = jax.random.normal(k1, (C, Ch), dtype=jnp.float32) * 0.2
    b1 = jax.random.normal(k2, (Ch,), dtype=jnp.float32) * 0.1
    w2 = jax.random.normal(k3, (Ch, C), dtype=jnp.float32) * 0.2
    b2 = jax.random.normal(k4, (C,), dtype=jnp.float32) * 0.1

    # SpatialGate: Conv2d(2, 1, 7, padding=3, bias=False) + BatchNorm2d(1).
    w_conv = jax.random.normal(k5, (2, 7, 7), dtype=jnp.float32) * 0.1
    gamma = jnp.float32(0.9)       # deterministic BN (eval-mode) parameters
    beta = jnp.float32(0.05)
    running_mean = jnp.float32(0.02)
    running_var = jnp.float32(1.2)
    eps = 1e-5

    # Fold BatchNorm (eval mode) into the conv-as-matrix + a scalar shift.
    bn_scale = gamma / jnp.sqrt(running_var + eps)
    kmat = build_conv_matrix(w_conv, bn_scale, H, W)               # (2HW, HW)
    shift = (beta - running_mean * bn_scale).reshape(1)            # (1,)

    out = cbam_pallas(x, w1,
                      b1.reshape(1, Ch), w2, b2.reshape(1, C),
                      kmat, shift)
    out = jax.block_until_ready(out)

    ref = cbam_reference(x, w1, b1, w2, b2, w_conv,
                         gamma, beta, running_mean, running_var, eps)
    np.testing.assert_allclose(np.asarray(out), np.asarray(ref),
                               rtol=1e-4, atol=1e-4)

    print("KERNEL_OK")
</pallas_src>

<mosaic_0001>
module attributes {stable_mosaic.version = 11 : i64} {
  func.func @cbam_kernel(%arg0: i32, %arg1: memref<1x32x256xf32, #tpu.memory_space<vmem>>, %arg2: memref<32x2xf32, #tpu.memory_space<vmem>>, %arg3: memref<1x2xf32, #tpu.memory_space<vmem>>, %arg4: memref<2x32xf32, #tpu.memory_space<vmem>>, %arg5: memref<1x32xf32, #tpu.memory_space<vmem>>, %arg6: memref<512x256xf32, #tpu.memory_space<vmem>>, %arg7: memref<1xf32, #tpu.memory_space<smem>>, %arg8: memref<1x32x256xf32, #tpu.memory_space<vmem>>) attributes {dimension_semantics = [#tpu.dimension_semantics<parallel>], iteration_bounds = array<i64: 2>, scalar_prefetch = 0 : i64, scratch_operands = 0 : i64, tpu.core_type = #tpu.core_type<tc>, window_params = [{transform_indices = @transform_0, window_bounds = array<i64: 1, 32, 256>}, {pipeline_mode = #tpu.pipeline_mode<synchronous>, transform_indices = @transform_1, window_bounds = array<i64: 32, 2>}, {pipeline_mode = #tpu.pipeline_mode<synchronous>, transform_indices = @transform_2, window_bounds = array<i64: 1, 2>}, {pipeline_mode = #tpu.pipeline_mode<synchronous>, transform_indices = @transform_3, window_bounds = array<i64: 2, 32>}, {pipeline_mode = #tpu.pipeline_mode<synchronous>, transform_indices = @transform_4, window_bounds = array<i64: 1, 32>}, {pipeline_mode = #tpu.pipeline_mode<synchronous>, transform_indices = @transform_5, window_bounds = array<i64: 512, 256>}, {transform_indices = @transform_6, window_bounds = array<i64: 1>}, {transform_indices = @transform_7, window_bounds = array<i64: 1, 32, 256>}]} {
    %c0 = arith.constant 0 : index
    %c0_0 = arith.constant 0 : index
    %c0_1 = arith.constant 0 : index
    %0 = vector.load %arg1[%c0, %c0_0, %c0_1] : memref<1x32x256xf32, #tpu.memory_space<vmem>>, vector<1x32x256xf32>
    %cst = arith.constant dense<0.000000e+00> : vector<1x32xf32>
    %1 = vector.multi_reduction <add>, %0, %cst [2] : vector<1x32x256xf32> to vector<1x32xf32>
    %cst_2 = arith.constant 3.906250e-03 : f32
    %2 = vector.broadcast %cst_2 : f32 to vector<1x32xf32>
    %3 = arith.mulf %1, %2 : vector<1x32xf32>
    %cst_3 = arith.constant dense<0xFF800000> : vector<1x32xf32>
    %4 = vector.multi_reduction <maximumf>, %0, %cst_3 [2] : vector<1x32x256xf32> to vector<1x32xf32>
    %5 = tpu.concatenate %3, %4 in 0 : vector<1x32xf32>, vector<1x32xf32> -> vector<2x32xf32>
    %c0_4 = arith.constant 0 : index
    %c0_5 = arith.constant 0 : index
    %6 = vector.load %arg2[%c0_4, %c0_5] : memref<32x2xf32, #tpu.memory_space<vmem>>, vector<32x2xf32>
    %cst_6 = arith.constant dense<0.000000e+00> : vector<2x2xf32>
    %7 = tpu.matmul %5, %6, %cst_6 {dimension_numbers = #tpu.dot_dimension_numbers<[1], [0], [0], [1], [0, 0, 1, 1], [], []>} : vector<2x32xf32>, vector<32x2xf32>, vector<2x2xf32> -> vector<2x2xf32>
    %c0_7 = arith.constant 0 : index
    %c0_8 = arith.constant 0 : index
    %8 = vector.load %arg3[%c0_7, %c0_8] : memref<1x2xf32, #tpu.memory_space<vmem>>, vector<1x2xf32>
    %9 = vector.broadcast %8 : vector<1x2xf32> to vector<2x2xf32>
    %10 = arith.addf %7, %9 : vector<2x2xf32>
    %cst_9 = arith.constant 0.000000e+00 : f32
    %11 = vector.broadcast %cst_9 : f32 to vector<2x2xf32>
    %12 = arith.maximumf %10, %11 : vector<2x2xf32>
    %c0_10 = arith.constant 0 : index
    %c0_11 = arith.constant 0 : index
    %13 = vector.load %arg4[%c0_10, %c0_11] : memref<2x32xf32, #tpu.memory_space<vmem>>, vector<2x32xf32>
    %cst_12 = arith.constant dense<0.000000e+00> : vector<2x32xf32>
    %14 = tpu.matmul %12, %13, %cst_12 {dimension_numbers = #tpu.dot_dimension_numbers<[1], [0], [0], [1], [0, 0, 1, 1], [], []>} : vector<2x2xf32>, vector<2x32xf32>, vector<2x32xf32> -> vector<2x32xf32>
    %c0_13 = arith.constant 0 : index
    %c0_14 = arith.constant 0 : index
    %15 = vector.load %arg5[%c0_13, %c0_14] : memref<1x32xf32, #tpu.memory_space<vmem>>, vector<1x32xf32>
    %16 = vector.broadcast %15 : vector<1x32xf32> to vector<2x32xf32>
    %17 = arith.addf %14, %16 : vector<2x32xf32>
    %18 = vector.extract_strided_slice %17 {offsets = [0, 0], sizes = [1, 32], strides = [1, 1]} : vector<2x32xf32> to vector<1x32xf32>
    %19 = vector.extract_strided_slice %17 {offsets = [1, 0], sizes = [1, 32], strides = [1, 1]} : vector<2x32xf32> to vector<1x32xf32>
    %20 = arith.addf %18, %19 : vector<1x32xf32>
    %21 = arith.negf %20 : vector<1x32xf32>
    %22 = math.exp %21 : vector<1x32xf32>
    %cst_15 = arith.constant 1.000000e+00 : f32
    %23 = vector.broadcast %cst_15 : f32 to vector<1x32xf32>
    %24 = arith.addf %23, %22 : vector<1x32xf32>
    %25 = arith.divf %23, %24 : vector<1x32xf32>
    %26 = vector.shape_cast %25 : vector<1x32xf32> to vector<1x32x1xf32>
    %27 = vector.broadcast %26 : vector<1x32x1xf32> to vector<1x32x256xf32>
    %28 = arith.mulf %0, %27 : vector<1x32x256xf32>
    %cst_16 = arith.constant dense<0xFF800000> : vector<1x256xf32>
    %29 = vector.multi_reduction <maximumf>, %28, %cst_16 [1] : vector<1x32x256xf32> to vector<1x256xf32>
    %cst_17 = arith.constant dense<0.000000e+00> : vector<1x256xf32>
    %30 = vector.multi_reduction <add>, %28, %cst_17 [1] : vector<1x32x256xf32> to vector<1x256xf32>
    %cst_18 = arith.constant 3.125000e-02 : f32
    %31 = vector.broadcast %cst_18 : f32 to vector<1x256xf32>
    %32 = arith.mulf %30, %31 : vector<1x256xf32>
    %33 = tpu.concatenate %29, %32 in 1 : vector<1x256xf32>, vector<1x256xf32> -> vector<1x512xf32>
    %c0_19 = arith.constant 0 : index
    %c0_20 = arith.constant 0 : index
    %34 = vector.load %arg6[%c0_19, %c0_20] : memref<512x256xf32, #tpu.memory_space<vmem>>, vector<512x256xf32>
    %cst_21 = arith.constant dense<0.000000e+00> : vector<1x256xf32>
    %35 = tpu.matmul %33, %34, %cst_21 {dimension_numbers = #tpu.dot_dimension_numbers<[1], [0], [0], [1], [0, 0, 1, 1], [], []>} : vector<1x512xf32>, vector<512x256xf32>, vector<1x256xf32> -> vector<1x256xf32>
    %c0_22 = arith.constant 0 : index
    %36 = memref.load %arg7[%c0_22] : memref<1xf32, #tpu.memory_space<smem>>
    %37 = vector.broadcast %36 : f32 to vector<1x256xf32>
    %38 = arith.addf %35, %37 : vector<1x256xf32>
    %39 = arith.negf %38 : vector<1x256xf32>
    %40 = math.exp %39 : vector<1x256xf32>
    %cst_23 = arith.constant 1.000000e+00 : f32
    %41 = vector.broadcast %cst_23 : f32 to vector<1x256xf32>
    %42 = arith.addf %41, %40 : vector<1x256xf32>
    %43 = arith.divf %41, %42 : vector<1x256xf32>
    %44 = vector.shape_cast %43 : vector<1x256xf32> to vector<1x1x256xf32>
    %45 = vector.broadcast %44 : vector<1x1x256xf32> to vector<1x32x256xf32>
    %46 = arith.mulf %28, %45 : vector<1x32x256xf32>
    %c0_24 = arith.constant 0 : index
    %c0_25 = arith.constant 0 : index
    %c0_26 = arith.constant 0 : index
    %47 = vector.load %arg8[%c0_24, %c0_25, %c0_26] : memref<1x32x256xf32, #tpu.memory_space<vmem>>, vector<1x32x256xf32>
    tpu.vector_store %arg8[%c0_24, %c0_25, %c0_26], %46 {strides = array<i32>} : memref<1x32x256xf32, #tpu.memory_space<vmem>>, vector<1x32x256xf32>,
    return
  }
  func.func @transform_0(%arg0: i32) -> (i32, i32, i32) {
    %c0_i32 = arith.constant 0 : i32
    %c0_i32_0 = arith.constant 0 : i32
    %c0_i32_1 = arith.constant 0 : i32
    return %arg0, %c0_i32, %c0_i32_0 : i32, i32, i32
  }
  func.func @transform_1(%arg0: i32) -> (i32, i32) {
    %c0_i32 = arith.constant 0 : i32
    %c0_i32_0 = arith.constant 0 : i32
    %c0_i32_1 = arith.constant 0 : i32
    return %c0_i32, %c0_i32_0 : i32, i32
  }
  func.func @transform_2(%arg0: i32) -> (i32, i32) {
    %c0_i32 = arith.constant 0 : i32
    %c0_i32_0 = arith.constant 0 : i32
    %c0_i32_1 = arith.constant 0 : i32
    return %c0_i32, %c0_i32_0 : i32, i32
  }
  func.func @transform_3(%arg0: i32) -> (i32, i32) {
    %c0_i32 = arith.constant 0 : i32
    %c0_i32_0 = arith.constant 0 : i32
    %c0_i32_1 = arith.constant 0 : i32
    return %c0_i32, %c0_i32_0 : i32, i32
  }
  func.func @transform_4(%arg0: i32) -> (i32, i32) {
    %c0_i32 = arith.constant 0 : i32
    %c0_i32_0 = arith.constant 0 : i32
    %c0_i32_1 = arith.constant 0 : i32
    return %c0_i32, %c0_i32_0 : i32, i32
  }
  func.func @transform_5(%arg0: i32) -> (i32, i32) {
    %c0_i32 = arith.constant 0 : i32
    %c0_i32_0 = arith.constant 0 : i32
    %c0_i32_1 = arith.constant 0 : i32
    return %c0_i32, %c0_i32_0 : i32, i32
  }
  func.func @transform_6(%arg0: i32) -> i32 {
    %c0_i32 = arith.constant 0 : i32
    %c0_i32_0 = arith.constant 0 : i32
    return %c0_i32 : i32
  }
  func.func @transform_7(%arg0: i32) -> (i32, i32, i32) {
    %c0_i32 = arith.constant 0 : i32
    %c0_i32_0 = arith.constant 0 : i32
    %c0_i32_1 = arith.constant 0 : i32
    return %arg0, %c0_i32, %c0_i32_0 : i32, i32, i32
  }
}

</mosaic_0001>

<bundles_post_ra>
// kernel: cbam_pallas.1
= control target key start
LH: loop header
LB: loop body
LE: loop exit
PB: predicated region body
PF: predicated region fallthrough
CT: control target
= control target key end

     0   :  { %s1223_s0 = inlined_call_operand.vmem [shape: f32[2,32,256], index: 0, kind: input, shape index: {}]   ;;  %s1224_s1 = inlined_call_operand.vmem [shape: f32[32,2], index: 1, kind: input, shape index: {}]   ;;  %s1225_s2 = inlined_call_operand.vmem [shape: f32[1,2], index: 2, kind: input, shape index: {}]   ;;  %s1226_s3 = inlined_call_operand.vmem [shape: f32[2,32], index: 3, kind: input, shape index: {}]   ;;  %s1227_s4 = inlined_call_operand.vmem [shape: f32[1,32], index: 4, kind: input, shape index: {}]   ;;  %s1228_s5 = inlined_call_operand.hbm [shape: f32[512,256], index: 5, kind: input, shape index: {}]   ;;  %s1229_s6 = inlined_call_operand.<no memory space> [shape: f32[1], index: 6, kind: input, shape index: {}]   ;;  %s1230_s7 = inlined_call_operand.vmem [shape: f32[2,32,256], index: 7, kind: output, shape index: {}]  }
   0x1   :  { %12 = sst [smem:[#allocation2]] %s1229_s6 }
   0x2   :  { %13 = vsyncpa [#allocation4], 0  ;;  %s1089_s26 = smov 0  }
   0x3 LB: > { %s225_s29 = sshll.u32 %s1228_s5, 4  ;;  %s940_s30 = sadd.s32 4294967295, %s1041_s26   ;;  %s1041_s26 = sphi %s1089_s26, %s19_s26   ;;  %s226_s29 = int_to_ptr.hbm [resolvable:$true] %s225_s29 }
   0x4   : > { %p942_p0 = scmp.ge.s32.totalorder %s1041_s26, 1  ;;  %p202_p1 = scmp.lt.s32.totalorder %s1041_s26, 3 }
   0x5   : > { %p969_p2 = scmp.eq.s32.totalorder %s940_s30, 0  ;;  %s1043_s6 = smov [#allocation3]  }
   0x6   : > { %p203_p3 = pnand %p942_p0, %p202_p1  ;;  %s227_s8 = sshll.u32 %s1043_s6, 4  ;;  %s228_s8 = int_to_ptr.vmem [resolvable:$true] %s227_s8 }
   0x7   : > { %s1044_s9 = smov 256   ;;  %s1045_s10 = smov 16  }
   0x8   : > { %p965_p4 = pneg %p203_p3  ;;  %254 = sbr.rel (%p203_p3) target bundleno = 769 (0x301), region = 48 }
   0xa   : > { %p966_p5 = pnand %p969_p2, %p965_p4 }
   0xc   : > { %968 = dma.hbm_to_vmem [thread:$0]  (!%p966_p5), %s226_s29, 16384, %s228_s8, [#allocation4], %s1044_s9, %s1044_s9, %s1045_s10  }
   0xd   : > { %1036 = dma.done.wait (%p969_p2), [#allocation4], 16384  }
   0xe   : > { %1038 = vsyncadd (%p969_p2), [#allocation4], 4294950912  ;;  %p287_p6 = scmp.lt.s32.totalorder %s940_s30, 1  ;;  %v370_v16 = vld [vmem:[%s1224_s1 + $0x18] sm:$0xff]  ;;  %v369_v17 = vld [vmem:[%s1224_s1 + $0x10] sm:$0xff]  ;;  %v337_v23 = vlaneseq  ;;  %vm342_vm0 = vcmask 130112  }
   0xf   : > { %391 = vmatpush.msra.mxu0 %v370_v16  ;;  %v368_v18 = vld [vmem:[%s1224_s1 + $0x8] sm:$0xff]  ;;  %v367_v19 = vld [vmem:[%s1224_s1] sm:$0xff]  ;;  %vm346_vm1 = vcmask 195712   ;;  %vm350_vm2 = vcmask 261312   ;;  %vm365_vm3 = vcmask 1040384   ;;  %vm375_vm4 = vcmask 261120  }
  0x10   : > { %s1232_s30 = smov (!%p287_p6, %s940_s30), 1  ;;  %v338_v24 = vand.u32 127, %v337_v23  ;;  %v400_v52 = vld [vmem:[%s1226_s3] sm:$0x3]  ;;  %vm409_vm5 = vcmask 1041408   ;;  %vm405_vm6 = vcmask 15360  }
  0x11   : > { %s959_s11 = sshll.u32 %s1232_s30, 6  ;;  %392 = vmatpush.msra.mxu0 %v369_v17  ;;  %952 = vmatpush.msk.msra.mxu1 %vm409_vm5, %v400_v52  ;;  %v987_v53 = vld [vmem:[%s1225_s2] ss:$0 sm:$0xff]  ;;  %v1158_v57 = vshrl.u32 %v337_v23, 7  ;;  %v553_v16 = vld [vmem:[#allocation3 + $0xd0] sm:$0xff]  ;;  %s655_s6 = sld [smem:[#allocation2]] }
  0x12   : > { %s291_s14 = scalar_lea.vmem %s1223_s0, %s959_s11  ;;  %v340_v27 = vadd.s32 4294967288, %v338_v24  ;;  %v344_v30 = vadd.s32 4294967280, %v338_v24  ;;  %v348_v35 = vadd.s32 4294967272, %v338_v24  ;;  %v988_v60 = vld [vmem:[%s1227_s4] ss:$0 sm:$0xff]  ;;  %v541_v52 = vld [vmem:[#allocation3 + $0x70] sm:$0xff]  ;;  %s296_s10 = scalar_lea.vmem %s1230_s7, %s959_s11 }
  0x13   : > { %v1108_v0 = vld [vmem:[%s291_s14] sm:$0xff]  ;;  %v1110_v1 = vld [vmem:[%s291_s14 + $0x8] sm:$0xff]  ;;  %v1122_v7 = vld [vmem:[%s291_s14 + $0x10] sm:$0xff]  ;;  %393 = vmatpush.msra.mxu0 %v368_v18  ;;  %982 = vset.pattern.permute.xlu2 %v1158_v57  ;;  %v471_v58 = vadd.s32 16, %v1158_v57  ;;  %v465_v59 = vadd.s32 8, %v1158_v57 }
  0x14   : > { %v1112_v2 = vld [vmem:[%s291_s14 + $0x20] sm:$0xff]  ;;  %v321_v3 = vmax.f32 %v1108_v0, %v1110_v1  ;;  %v305_v4 = vadd.f32 %v1110_v1, %v1108_v0  ;;  %v1118_v5 = vld [vmem:[%s291_s14 + $0x28] sm:$0xff]  ;;  %v1124_v8 = vld [vmem:[%s291_s14 + $0x18] sm:$0xff] }
  0x15   : > { %v311_v6 = vadd.f32 %v1118_v5, %v1112_v2  ;;  %v1126_v9 = vld [vmem:[%s291_s14 + $0x30] sm:$0xff]  ;;  %v1128_v10 = vld [vmem:[%s291_s14 + $0x38] sm:$0xff]  ;;  %v324_v11 = vmax.f32 %v1122_v7, %v1124_v8  ;;  %v308_v12 = vadd.f32 %v1124_v8, %v1122_v7  ;;  %v327_v14 = vmax.f32 %v1112_v2, %v1118_v5  ;;  %394 = vmatpush.msra.mxu0 %v367_v19  ;;  %v651_v23 = vld [vmem:[#allocation3 + $0x3e0] sm:$0xff] }
  0x16   : > { %322 = vmax.xlane.f32.xlu2 %v321_v3  ;;  %306 = vadd.xlane.f32.xlu0 %v305_v4  ;;  %v314_v13 = vadd.f32 %v1128_v10, %v1126_v9  ;;  %v330_v15 = vmax.f32 %v1126_v9, %v1128_v10  ;;  %v585_v18 = vld [vmem:[#allocation3 + $0x1d0] sm:$0xff] }
  0x17   : > { %312 = vadd.xlane.f32.xlu1 %v311_v6  ;;  %983 = vset.pattern.permute.xlu0 %v465_v59  ;;  %v621_v19 = vld [vmem:[#allocation3 + $0x2f0] sm:$0xff]  ;;  %v639_v59 = vld [vmem:[#allocation3 + $0x380] sm:$0xff] }
  0x18   : > { %984 = vset.pattern.permute.xlu1 %v471_v58  ;;  %697 = vmatpush.msrb.mxu1 %v621_v19  ;;  %v607_v58 = vld [vmem:[#allocation3 + $0x280] sm:$0xff] }
  0x19   : > { %v631_v19 = vld [vmem:[#allocation3 + $0x340] sm:$0xff] }
  0x1e   : > { %325 = vmax.xlane.f32.xlu2 %v324_v11  ;;  %309 = vadd.xlane.f32.xlu0 %v308_v12  ;;  %v557_v12 = vld [vmem:[#allocation3 + $0xf0] sm:$0xff] }
  0x1f   : > { %315 = vadd.xlane.f32.xlu1 %v314_v13  ;;  %v589_v13 = vld [vmem:[#allocation3 + $0x1f0] sm:$0xff]  ;;  %657 = vmatpush.msra.mxu2 %v557_v12 }
  0x20   : > { %677 = vmatpush.msra.mxu3 %v589_v13  ;;  %v533_v12 = vld [vmem:[#allocation3 + $0x30] sm:$0xff] }
  0x21   : > { %v565_v13 = vld [vmem:[#allocation3 + $0x130] sm:$0xff] }
  0x26   : > { %328 = vmax.xlane.f32.xlu0 %v327_v14  ;;  %v555_v14 = vld [vmem:[#allocation3 + $0xe0] sm:$0xff] }
  0x27   : > { %331 = vmax.xlane.f32.xlu1 %v330_v15  ;;  %v587_v15 = vld [vmem:[#allocation3 + $0x1e0] sm:$0xff]  ;;  %658 = vmatpush.msra.mxu2 %v555_v14  ;;  %v601_v14 = vld [vmem:[#allocation3 + $0x250] sm:$0xff] }
  0x28   : > { %678 = vmatpush.msra.mxu3 %v587_v15  ;;  %v633_v15 = vld [vmem:[#allocation3 + $0x350] sm:$0xff] }
  0x29   : > { %659 = vmatpush.msra.mxu2 %v553_v16  ;;  %v531_v16 = vld [vmem:[#allocation3 + $0x20] sm:$0xff] }
  0x2a   : > { %679 = vmatpush.msra.mxu3 %v585_v18  ;;  %v599_v18 = vld [vmem:[#allocation3 + $0x240] sm:$0xff] }
  0x89   : > { %v307_v20 = vpop.xlane.xlu0 %306  ;;  %v323_v21 = vpop.xlane.xlu2 %322 }
  0x8a   : > { %v313_v22 = vpop.xlane.xlu1 %312  ;;  %v317_v25 = vmul.f32 0.00390625, %v307_v20  ;;  %v357_v37 = vperm.slane %v323_v21, %v338_v24  ;;  %v653_v20 = vld [vmem:[#allocation3 + $0x3f0] sm:$0xff] }
  0x8b   : > { %v319_v31 = vmul.f32 0.00390625, %v313_v22  ;;  %v619_v22 = vld [vmem:[#allocation3 + $0x2e0] sm:$0xff]  ;;  %717 = vmatpush.msrb.mxu0 %v653_v20  ;;  %v529_v20 = vld [vmem:[#allocation3 + $0x10] sm:$0xff] }
  0x8c   : > { %v339_v34 = vperm.slane %v317_v25, %v338_v24  ;;  %v551_v24 = vld [vmem:[#allocation3 + $0xc0] sm:$0xff]  ;;  %698 = vmatpush.msrb.mxu1 %v619_v22  ;;  %v597_v22 = vld [vmem:[#allocation3 + $0x230] sm:$0xff] }
  0x8d   : > { %v345_v40 = vperm.slane %v319_v31, %v344_v30  ;;  %v583_v25 = vld [vmem:[#allocation3 + $0x1c0] sm:$0xff]  ;;  %718 = vmatpush.msrb.mxu0 %v651_v23  ;;  %v581_v31 = vld [vmem:[#allocation3 + $0x1b0] sm:$0xff]  ;;  %660 = vmatpush.msra.mxu2 %v551_v24 }
  0x8e   : > { %680 = vmatpush.msra.mxu3 %v583_v25  ;;  %v629_v23 = vld [vmem:[#allocation3 + $0x330] sm:$0xff]  ;;  %v527_v24 = vld [vmem:[#allocation3] sm:$0xff] }
  0x8f   : > { %v559_v25 = vld [vmem:[#allocation3 + $0x100] sm:$0xff] }
  0x90   : > { %681 = vmatpush.msra.mxu3 %v581_v31  ;;  %v625_v31 = vld [vmem:[#allocation3 + $0x310] sm:$0xff] }
  0x91   : > { %v310_v26 = vpop.xlane.xlu0 %309  ;;  %v326_v32 = vpop.xlane.xlu2 %325 }
  0x92   : > { %v318_v28 = vmul.f32 0.00390625, %v310_v26  ;;  %v316_v29 = vpop.xlane.xlu1 %315  ;;  %v358_v38 = vperm.slane %v326_v32, %v340_v27 }
  0x93   : > { %v320_v36 = vmul.f32 0.00390625, %v316_v29 }
  0x94   : > { %v341_v33 = vperm.slane %v318_v28, %v340_v27  ;;  %v359_v46 = vsel %vm342_vm0, %v358_v38, %v357_v37  ;;  %v617_v27 = vld [vmem:[#allocation3 + $0x2d0] sm:$0xff]  ;;  %v579_v37 = vld [vmem:[#allocation3 + $0x1a0] sm:$0xff] }
  0x95   : > { %v349_v41 = vperm.slane %v320_v36, %v348_v35  ;;  %v649_v28 = vld [vmem:[#allocation3 + $0x3d0] sm:$0xff]  ;;  %699 = vmatpush.msrb.mxu1 %v617_v27  ;;  %v547_v36 = vld [vmem:[#allocation3 + $0xa0] sm:$0xff]  ;;  %682 = vmatpush.msra.mxu3 %v579_v37  ;;  %v586_v37 = vld [vmem:[#allocation3 + $0x1d8] sm:$0xff] }
  0x96   : > { %v343_v39 = vsel %vm342_vm0, %v341_v33, %v339_v34  ;;  %v615_v34 = vld [vmem:[#allocation3 + $0x2c0] sm:$0xff]  ;;  %719 = vmatpush.msrb.mxu0 %v649_v28  ;;  %v558_v28 = vld [vmem:[#allocation3 + $0xf8] sm:$0xff] }
  0x97   : > { %v347_v45 = vsel %vm346_vm1, %v345_v40, %v343_v39  ;;  %700 = vmatpush.msrb.mxu1 %v615_v34  ;;  %v627_v27 = vld [vmem:[#allocation3 + $0x320] sm:$0xff] }
  0x98   : > { %v351_v49 = vsel %vm350_vm2, %v349_v41, %v347_v45  ;;  %v577_v45 = vld [vmem:[#allocation3 + $0x190] sm:$0xff]  ;;  %v591_v34 = vld [vmem:[#allocation3 + $0x200] sm:$0xff] }
  0x99   : > { %v329_v42 = vpop.xlane.xlu0 %328  ;;  %683 = vmatpush.msra.mxu3 %v577_v45  ;;  %v582_v45 = vld [vmem:[#allocation3 + $0x1b8] sm:$0xff] }
  0x9a   : > { %v360_v43 = vperm.slane %v329_v42, %v344_v30  ;;  %v332_v44 = vpop.xlane.xlu1 %331  ;;  %v549_v30 = vld [vmem:[#allocation3 + $0xb0] sm:$0xff] }
  0x9b   : > { %v362_v47 = vperm.slane %v332_v44, %v348_v35  ;;  %v647_v35 = vld [vmem:[#allocation3 + $0x3c0] sm:$0xff]  ;;  %661 = vmatpush.msra.mxu2 %v549_v30  ;;  %v545_v44 = vld [vmem:[#allocation3 + $0x90] sm:$0xff] }
  0x9c   : > { %v361_v48 = vsel %vm346_vm1, %v360_v43, %v359_v46  ;;  %720 = vmatpush.msrb.mxu0 %v647_v35  ;;  %v477_v43 = vadd.s32 24, %v1158_v57  ;;  %v613_v46 = vld [vmem:[#allocation3 + $0x2b0] sm:$0xff]  ;;  %v571_v57 = vld [vmem:[#allocation3 + $0x160] sm:$0xff] }
  0x9d   : > { %v363_v50 = vsel %vm350_vm2, %v362_v47, %v361_v48  ;;  %662 = vmatpush.msra.mxu2 %v547_v36  ;;  %v645_v47 = vld [vmem:[#allocation3 + $0x3b0] sm:$0xff]  ;;  %v543_v48 = vld [vmem:[#allocation3 + $0x80] sm:$0xff]  ;;  %701 = vmatpush.msrb.mxu1 %v613_v46  ;;  %v554_v36 = vld [vmem:[#allocation3 + $0xd8] sm:$0xff] }
  0x9e   : > { %v366_v51 = vsel %vm365_vm3, %v351_v49, %v363_v50  ;;  %v575_v49 = vld [vmem:[#allocation3 + $0x180] sm:$0xff]  ;;  %721 = vmatpush.msrb.mxu0 %v645_v47  ;;  %v593_v30 = vld [vmem:[#allocation3 + $0x210] sm:$0xff]  ;;  %v618_v46 = vld [vmem:[#allocation3 + $0x2d8] sm:$0xff] }
  0x9f   : > { %951 = vmatmul.msk.f32.vlgmr.msra.gmra.mxu0 %vm375_vm4, %v366_v51  ;;  %663 = vmatpush.msra.mxu2 %v545_v44  ;;  %v611_v50 = vld [vmem:[#allocation3 + $0x2a0] sm:$0xff]  ;;  %v550_v44 = vld [vmem:[#allocation3 + $0xb8] sm:$0xff] }
  0xa0   : > { %v643_v51 = vld [vmem:[#allocation3 + $0x3a0] sm:$0xff]  ;;  %684 = vmatpush.msra.mxu3 %v575_v49  ;;  %702 = vmatpush.msrb.mxu1 %v611_v50  ;;  %v650_v47 = vld [vmem:[#allocation3 + $0x3d8] sm:$0xff]  ;;  %v580_v49 = vld [vmem:[#allocation3 + $0x1a8] sm:$0xff] }
  0xa1   : > { %664 = vmatpush.msra.mxu2 %v543_v48  ;;  %722 = vmatpush.msrb.mxu0 %v643_v51  ;;  %v623_v35 = vld [vmem:[#allocation3 + $0x300] sm:$0xff]  ;;  %v548_v48 = vld [vmem:[#allocation3 + $0xa8] sm:$0xff] }
  0xa2   : > { %v616_v50 = vld [vmem:[#allocation3 + $0x2c8] sm:$0xff] }
  0xa3   : > { %665 = vmatpush.msra.mxu2 %v541_v52  ;;  %v648_v51 = vld [vmem:[#allocation3 + $0x3c8] sm:$0xff]  ;;  %v546_v52 = vld [vmem:[#allocation3 + $0x98] sm:$0xff] }
 0x11c   : > { %v396_v54 = vpop.f32.mrf.mxu0 }
 0x11d   : > { %v397_v55 = vadd.f32 %v987_v53, %v396_v54  ;;  %v573_v53 = vld [vmem:[#allocation3 + $0x170] sm:$0xff] }
 0x11e   : > { %v609_v54 = vld [vmem:[#allocation3 + $0x290] sm:$0xff]  ;;  %685 = vmatpush.msra.mxu3 %v573_v53  ;;  %v578_v53 = vld [vmem:[#allocation3 + $0x198] sm:$0xff] }
 0x11f   : > { %v399_v56 = vmax.f32 %v397_v55, 0.0  ;;  %v641_v55 = vld [vmem:[#allocation3 + $0x390] sm:$0xff]  ;;  %703 = vmatpush.msrb.mxu1 %v609_v54  ;;  %v614_v54 = vld [vmem:[#allocation3 + $0x2b8] sm:$0xff] }
 0x120   : > { %723 = vmatpush.msrb.mxu0 %v641_v55  ;;  %686 = vmatpush.msra.mxu3 %v571_v57  ;;  %v646_v55 = vld [vmem:[#allocation3 + $0x3b8] sm:$0xff]  ;;  %v576_v57 = vld [vmem:[#allocation3 + $0x188] sm:$0xff] }
 0x121   : > { %953 = vmatmul.msk.f32.vlgmr.msra.gmra.mxu1 %vm405_vm6, %v399_v56  ;;  %v539_v56 = vld [vmem:[#allocation3 + $0x60] sm:$0xff] }
 0x122   : > { %666 = vmatpush.msra.mxu2 %v539_v56  ;;  %704 = vmatpush.msrb.mxu1 %v607_v58  ;;  %v544_v56 = vld [vmem:[#allocation3 + $0x88] sm:$0xff] }
 0x123   : > { %724 = vmatpush.msrb.mxu0 %v639_v59  ;;  %v612_v58 = vld [vmem:[#allocation3 + $0x2a8] sm:$0xff] }
 0x124   : > { %v644_v59 = vld [vmem:[#allocation3 + $0x3a8] sm:$0xff] }
 0x19e   : > { %v430_v61 = vpop.f32.mrf.mxu1 }
 0x19f   : > { %v431_v62 = vadd.f32 %v988_v60, %v430_v61  ;;  %v537_v60 = vld [vmem:[#allocation3 + $0x50] sm:$0xff] }
 0x1a0   : > { %v569_v61 = vld [vmem:[#allocation3 + $0x150] sm:$0xff]  ;;  %667 = vmatpush.msra.mxu2 %v537_v60  ;;  %v542_v60 = vld [vmem:[#allocation3 + $0x78] sm:$0xff] }
 0x1a1   : > { %v434_v63 = vrot.slane %v431_v62, 1  ;;  %687 = vmatpush.msra.mxu3 %v569_v61  ;;  %v574_v61 = vld [vmem:[#allocation3 + $0x178] sm:$0xff] }
 0x1a3   : > { %v436_v3 = vadd.f32 %v434_v63, %v431_v62  ;;  %v605_v62 = vld [vmem:[#allocation3 + $0x270] sm:$0xff] }
 0x1a4   : > { %v637_v63 = vld [vmem:[#allocation3 + $0x370] sm:$0xff]  ;;  %705 = vmatpush.msrb.mxu1 %v605_v62  ;;  %v610_v62 = vld [vmem:[#allocation3 + $0x298] sm:$0xff] }
 0x1a5   : > { %v954_v4 = vmul.f32 -1.442695, %v436_v3  ;;  %v535_v3 = vld [vmem:[#allocation3 + $0x40] sm:$0xff]  ;;  %725 = vmatpush.msrb.mxu0 %v637_v63  ;;  %v642_v63 = vld [vmem:[#allocation3 + $0x398] sm:$0xff] }
 0x1a6   : > { %668 = vmatpush.msra.mxu2 %v535_v3  ;;  %v540_v3 = vld [vmem:[#allocation3 + $0x68] sm:$0xff] }
 0x1a7   : > { %989 = vpow2.f32 %v954_v4  ;;  %v567_v4 = vld [vmem:[#allocation3 + $0x140] sm:$0xff] }
 0x1a8   : > { %688 = vmatpush.msra.mxu3 %v567_v4  ;;  %669 = vmatpush.msra.mxu2 %v533_v12  ;;  %v572_v4 = vld [vmem:[#allocation3 + $0x168] sm:$0xff]  ;;  %v538_v12 = vld [vmem:[#allocation3 + $0x58] sm:$0xff] }
 0x1aa   : > { %689 = vmatpush.msra.mxu3 %v565_v13  ;;  %670 = vmatpush.msra.mxu2 %v531_v16  ;;  %v570_v13 = vld [vmem:[#allocation3 + $0x158] sm:$0xff]  ;;  %v536_v16 = vld [vmem:[#allocation3 + $0x48] sm:$0xff] }
 0x1ac   : > { %671 = vmatpush.msra.mxu2 %v529_v20  ;;  %v534_v20 = vld [vmem:[#allocation3 + $0x38] sm:$0xff] }
 0x1ad   : > { %v990_v6 = vpop.eup %989 }
 0x1ae   : > { %v440_v11 = vadd.f32 1.0, %v990_v6  ;;  %v603_v6 = vld [vmem:[#allocation3 + $0x260] sm:$0xff]  ;;  %672 = vmatpush.msra.mxu2 %v527_v24 }
 0x1af   : > { %706 = vmatpush.msrb.mxu1 %v603_v6  ;;  %v608_v6 = vld [vmem:[#allocation3 + $0x288] sm:$0xff] }
 0x1b0   : > { %991 = vrcp.f32 %v440_v11  ;;  %v452_v29 = vand.u32 2147483648, %v440_v11  ;;  %v450_v33 = vand.u32 2147483647, %v440_v11  ;;  %vm446_vm8 = vweird.f32 %v440_v11  ;;  %737 = vmatpush.msrb.mxu2 %v558_v28  ;;  %v632_v28 = vld [vmem:[#allocation3 + $0x348] sm:$0xff] }
 0x1b1   : > { %707 = vmatpush.msrb.mxu1 %v601_v14  ;;  %v606_v14 = vld [vmem:[#allocation3 + $0x278] sm:$0xff] }
 0x1b2   : > { %v453_v39 = vor.u32 1.1754944e-38, %v452_v29  ;;  %vm451_vm10 = vcmp.eq.f32.partialorder %v450_v33, 8.507059e+37  ;;  %v590_v29 = vld [vmem:[#allocation3 + $0x1f8] sm:$0xff]  ;;  %v588_v33 = vld [vmem:[#allocation3 + $0x1e8] sm:$0xff] }
 0x1b3   : > { %708 = vmatpush.msrb.mxu1 %v599_v18  ;;  %v604_v18 = vld [vmem:[#allocation3 + $0x268] sm:$0xff] }
 0x1b5   : > { %709 = vmatpush.msrb.mxu1 %v597_v22  ;;  %v602_v22 = vld [vmem:[#allocation3 + $0x258] sm:$0xff] }
 0x1b6   : > { %v992_v17 = vpop.eup %991 }
 0x1b7   : > { %v442_v21 = vmul.f32 %v992_v17, %v440_v11  ;;  %vm447_vm7 = vweird.f32 %v992_v17  ;;  %v635_v11 = vld [vmem:[#allocation3 + $0x360] sm:$0xff] }
 0x1b8   : > { %vm448_vm9 = vmor %vm446_vm8, %vm447_vm7  ;;  %726 = vmatpush.msrb.mxu0 %v635_v11  ;;  %v640_v11 = vld [vmem:[#allocation3 + $0x388] sm:$0xff] }
 0x1b9   : > { %v443_v26 = vsub.f32 1.0, %v442_v21  ;;  %v561_v21 = vld [vmem:[#allocation3 + $0x110] sm:$0xff] }
 0x1ba   : > { %727 = vmatpush.msrb.mxu0 %v633_v15  ;;  %v638_v15 = vld [vmem:[#allocation3 + $0x378] sm:$0xff] }
 0x1bb   : > { %v444_v32 = vmul.f32 %v992_v17, %v443_v26  ;;  %v595_v26 = vld [vmem:[#allocation3 + $0x220] sm:$0xff] }
 0x1bc   : > { %728 = vmatpush.msrb.mxu0 %v631_v19  ;;  %710 = vmatpush.msrb.mxu1 %v595_v26  ;;  %v636_v19 = vld [vmem:[#allocation3 + $0x368] sm:$0xff] }
 0x1bd   : > { %v445_v38 = vadd.f32 %v992_v17, %v444_v32  ;;  %v556_v32 = vld [vmem:[#allocation3 + $0xe8] sm:$0xff] }
 0x1be   : > { %729 = vmatpush.msrb.mxu0 %v629_v23  ;;  %711 = vmatpush.msrb.mxu1 %v593_v30  ;;  %v634_v23 = vld [vmem:[#allocation3 + $0x358] sm:$0xff]  ;;  %v564_v26 = vld [vmem:[#allocation3 + $0x128] sm:$0xff] }
 0x1bf   : > { %v449_v40 = vsel %vm448_vm9, %v992_v17, %v445_v38  ;;  %v563_v17 = vld [vmem:[#allocation3 + $0x120] sm:$0xff]  ;;  %738 = vmatpush.msrb.mxu2 %v556_v32  ;;  %v622_v38 = vld [vmem:[#allocation3 + $0x2f8] sm:$0xff] }
 0x1c0   : > { %v454_v41 = vsel %vm451_vm10, %v453_v39, %v449_v40  ;;  %690 = vmatpush.msra.mxu3 %v563_v17  ;;  %730 = vmatpush.msrb.mxu0 %v627_v27  ;;  %v654_v39 = vld [vmem:[#allocation3 + $0x3f8] sm:$0xff]  ;;  %v552_v40 = vld [vmem:[#allocation3 + $0xc8] sm:$0xff] }
 0x1c1   : > { %v456_v42 = vperm.slane %v454_v41, 0  ;;  %712 = vmatpush.msrb.mxu1 %v591_v34  ;;  %739 = vmatpush.msrb.mxu2 %v554_v36  ;;  %v584_v41 = vld [vmem:[#allocation3 + $0x1c8] sm:$0xff]  ;;  %v562_v30 = vld [vmem:[#allocation3 + $0x118] sm:$0xff] }
 0x1c2   : > { %691 = vmatpush.msra.mxu3 %v561_v21  ;;  %731 = vmatpush.msrb.mxu0 %v625_v31  ;;  %v568_v17 = vld [vmem:[#allocation3 + $0x148] sm:$0xff]  ;;  %v566_v21 = vld [vmem:[#allocation3 + $0x138] sm:$0xff] }
 0x1c3   : > { %473 = vperm.xlu1 %984, %v456_v42   ;;  %467 = vperm.xlu0 %983, %v456_v42   ;;  %v600_v27 = vld [vmem:[#allocation3 + $0x248] sm:$0xff]  ;;  %v598_v31 = vld [vmem:[#allocation3 + $0x238] sm:$0xff] }
 0x1c4   : > { %461 = vperm.xlu2 %982, %v456_v42   ;;  %692 = vmatpush.msra.mxu3 %v559_v25  ;;  %v532_v25 = vld [vmem:[#allocation3 + $0x28] sm:$0xff]  ;;  %v630_v32 = vld [vmem:[#allocation3 + $0x338] sm:$0xff] }
 0x1c5   : > { %732 = vmatpush.msrb.mxu0 %v623_v35  ;;  %777 = vmatpush.msra.mxu1 %v622_v38  ;;  %v560_v34 = vld [vmem:[#allocation3 + $0x108] sm:$0xff]  ;;  %v626_v38 = vld [vmem:[#allocation3 + $0x318] sm:$0xff] }
 0x1c6   : > { %757 = vmatpush.msrb.mxu3 %v590_v29  ;;  %740 = vmatpush.msrb.mxu2 %v552_v40  ;;  %v530_v29 = vld [vmem:[#allocation3 + $0x18] sm:$0xff]  ;;  %v596_v35 = vld [vmem:[#allocation3 + $0x228] sm:$0xff] }
 0x1c7   : > { %797 = vmatpush.msra.mxu0 %v654_v39  ;;  %v628_v36 = vld [vmem:[#allocation3 + $0x328] sm:$0xff] }
 0x1c8   : > { %758 = vmatpush.msrb.mxu3 %v588_v33  ;;  %741 = vmatpush.msrb.mxu2 %v550_v44  ;;  %v528_v33 = vld [vmem:[#allocation3 + $0x8] sm:$0xff] }
 0x1c9   : > { %v592_v40 = vld [vmem:[#allocation3 + $0x208] sm:$0xff] }
 0x1ca   : > { %759 = vmatpush.msrb.mxu3 %v586_v37  ;;  %742 = vmatpush.msrb.mxu2 %v548_v48  ;;  %v594_v37 = vld [vmem:[#allocation3 + $0x218] sm:$0xff] }
 0x1cb   : > { %986 = vset.pattern.permute.xlu0 %v477_v43 }
 0x1cc   : > { %985 = vset.pattern.permute.xlu2 %v477_v43  ;;  %v652_v43 = vld [vmem:[#allocation3 + $0x3e8] sm:$0xff]  ;;  %760 = vmatpush.msrb.mxu3 %v584_v41 }
 0x1cd   : > { %798 = vmatpush.msra.mxu0 %v652_v43  ;;  %743 = vmatpush.msrb.mxu2 %v546_v52  ;;  %v624_v41 = vld [vmem:[#allocation3 + $0x308] sm:$0xff] }
 0x1ce   : > { %761 = vmatpush.msrb.mxu3 %v582_v45 }
 0x1cf   : > { %799 = vmatpush.msra.mxu0 %v650_v47  ;;  %744 = vmatpush.msrb.mxu2 %v544_v56 }
 0x1d0   : > { %762 = vmatpush.msrb.mxu3 %v580_v49 }
 0x1d1   : > { %800 = vmatpush.msra.mxu0 %v648_v51  ;;  %745 = vmatpush.msrb.mxu2 %v542_v60 }
 0x1d2   : > { %763 = vmatpush.msrb.mxu3 %v578_v53 }
 0x1d3   : > { %801 = vmatpush.msra.mxu0 %v646_v55  ;;  %746 = vmatpush.msrb.mxu2 %v540_v3 }
 0x1d4   : > { %479 = vperm.xlu2 %985, %v456_v42   ;;  %v620_v42 = vld [vmem:[#allocation3 + $0x2e8] sm:$0xff]  ;;  %764 = vmatpush.msrb.mxu3 %v576_v57 }
 0x1d5   : > { %778 = vmatpush.msra.mxu1 %v620_v42  ;;  %802 = vmatpush.msra.mxu0 %v644_v59 }
 0x1d6   : > { %765 = vmatpush.msrb.mxu3 %v574_v61  ;;  %747 = vmatpush.msrb.mxu2 %v538_v12 }
 0x1d7   : > { %779 = vmatpush.msra.mxu1 %v618_v46  ;;  %803 = vmatpush.msra.mxu0 %v642_v63 }
 0x1d8   : > { %766 = vmatpush.msrb.mxu3 %v572_v4  ;;  %748 = vmatpush.msrb.mxu2 %v536_v16 }
 0x1d9   : > { %780 = vmatpush.msra.mxu1 %v616_v50  ;;  %804 = vmatpush.msra.mxu0 %v640_v11 }
 0x1da   : > { %767 = vmatpush.msrb.mxu3 %v570_v13  ;;  %749 = vmatpush.msrb.mxu2 %v534_v20 }
 0x1db   : > { %781 = vmatpush.msra.mxu1 %v614_v54  ;;  %805 = vmatpush.msra.mxu0 %v638_v15 }
 0x1dc   : > { %768 = vmatpush.msrb.mxu3 %v568_v17  ;;  %750 = vmatpush.msrb.mxu2 %v532_v25 }
 0x1dd   : > { %782 = vmatpush.msra.mxu1 %v612_v58  ;;  %806 = vmatpush.msra.mxu0 %v636_v19 }
 0x1de   : > { %769 = vmatpush.msrb.mxu3 %v566_v21  ;;  %751 = vmatpush.msrb.mxu2 %v530_v29 }
 0x1df   : > { %783 = vmatpush.msra.mxu1 %v610_v62  ;;  %807 = vmatpush.msra.mxu0 %v634_v23 }
 0x1e0   : > { %770 = vmatpush.msrb.mxu3 %v564_v26  ;;  %752 = vmatpush.msrb.mxu2 %v528_v33  ;;  %v656_v26 = vstv %s655_s6 }
 0x1e1   : > { %784 = vmatpush.msra.mxu1 %v608_v6  ;;  %808 = vmatpush.msra.mxu0 %v632_v28 }
 0x1e2   : > { %771 = vmatpush.msrb.mxu3 %v562_v30 }
 0x1e3   : > { %785 = vmatpush.msra.mxu1 %v606_v14  ;;  %809 = vmatpush.msra.mxu0 %v630_v32 }
 0x1e4   : > { %772 = vmatpush.msrb.mxu3 %v560_v34 }
 0x1e5   : > { %786 = vmatpush.msra.mxu1 %v604_v18  ;;  %810 = vmatpush.msra.mxu0 %v628_v36 }
 0x1e7   : > { %787 = vmatpush.msra.mxu1 %v602_v22  ;;  %811 = vmatpush.msra.mxu0 %v626_v38 }
 0x1e9   : > { %788 = vmatpush.msra.mxu1 %v600_v27  ;;  %812 = vmatpush.msra.mxu0 %v624_v41 }
 0x1eb   : > { %789 = vmatpush.msra.mxu1 %v598_v31 }
 0x1ed   : > { %790 = vmatpush.msra.mxu1 %v596_v35 }
 0x1ef   : > { %791 = vmatpush.msra.mxu1 %v594_v37 }
 0x1f1   : > { %792 = vmatpush.msra.mxu1 %v592_v40 }
 0x21e   : > { %v462_v24 = vpop.permute.xlu2 %461 }
 0x21f   : > { %v1168_v42 = vmul.f32 %v462_v24, %v1108_v0  ;;  %v1171_v43 = vmul.f32 %v462_v24, %v1110_v1 }
 0x22e   : > { %v480_v39 = vpop.permute.xlu2 %479 }
 0x22f   : > { %v1174_v44 = vmul.f32 %v480_v39, %v1126_v9  ;;  %v1177_v45 = vmul.f32 %v480_v39, %v1128_v10 }
 0x235   : > { %v474_v46 = vpop.permute.xlu1 %473  ;;  %v468_v47 = vpop.permute.xlu0 %467 }
 0x236   : > { %v1180_v48 = vmul.f32 %v474_v46, %v1112_v2  ;;  %v1183_v49 = vmul.f32 %v474_v46, %v1118_v5  ;;  %v1186_v0 = vmul.f32 %v468_v47, %v1122_v7  ;;  %v1189_v1 = vmul.f32 %v468_v47, %v1124_v8 }
 0x238   : > { %v489_v9 = vmax.f32 %v1168_v42, %v1180_v48  ;;  %v498_v10 = vmax.f32 %v1171_v43, %v1183_v49  ;;  %v490_v2 = vmax.f32 %v1186_v0, %v1174_v44  ;;  %v499_v5 = vmax.f32 %v1189_v1, %v1177_v45 }
 0x239   : > { %v507_v7 = vadd.f32 %v1186_v0, %v1168_v42  ;;  %v516_v8 = vadd.f32 %v1189_v1, %v1171_v43 }
 0x23a   : > { %v491_v50 = vmax.f32 %v489_v9, %v490_v2  ;;  %v500_v51 = vmax.f32 %v498_v10, %v499_v5 }
 0x23b   : > { %v508_v52 = vadd.f32 %v507_v7, %v1180_v48  ;;  %v517_v53 = vadd.f32 %v516_v8, %v1183_v49 }
 0x23c   : > { %v492_v54 = vrot.slane %v491_v50, 4  ;;  %v501_v55 = vrot.slane %v500_v51, 4 }
 0x23d   : > { %v509_v56 = vadd.f32 %v508_v52, %v1174_v44  ;;  %v518_v57 = vadd.f32 %v517_v53, %v1177_v45 }
 0x23e   : > { %v493_v58 = vmax.f32 %v491_v50, %v492_v54  ;;  %v502_v59 = vmax.f32 %v500_v51, %v501_v55 }
 0x23f   : > { %v510_v60 = vrot.slane %v509_v56, 4  ;;  %v519_v61 = vrot.slane %v518_v57, 4 }
 0x240   : > { %v494_v62 = vrot.slane %v493_v58, 2  ;;  %v503_v63 = vrot.slane %v502_v59, 2 }
 0x241   : > { %v511_v3 = vadd.f32 %v510_v60, %v509_v56  ;;  %v520_v4 = vadd.f32 %v519_v61, %v518_v57 }
 0x242   : > { %v495_v6 = vmax.f32 %v493_v58, %v494_v62  ;;  %v504_v11 = vmax.f32 %v502_v59, %v503_v63 }
 0x243   : > { %v512_v12 = vrot.slane %v511_v3, 2  ;;  %v521_v13 = vrot.slane %v520_v4, 2 }
 0x244   : > { %v496_v14 = vrot.slane %v495_v6, 1  ;;  %v505_v15 = vrot.slane %v504_v11, 1 }
 0x245   : > { %v513_v16 = vadd.f32 %v512_v12, %v511_v3  ;;  %v522_v17 = vadd.f32 %v521_v13, %v520_v4 }
 0x246   : > { %v497_v18 = vmax.f32 %v495_v6, %v496_v14  ;;  %v506_v19 = vmax.f32 %v504_v11, %v505_v15 }
 0x247   : > { %v514_v20 = vrot.slane %v513_v16, 1  ;;  %v523_v21 = vrot.slane %v522_v17, 1 }
 0x248   : > { %673 = vmatmul.f32.vlgmr.msra.gmra.mxu2 %v497_v18  ;;  %693 = vmatmul.f32.vlgmr.msra.gmra.mxu3 %v506_v19 }
 0x249   : > { %v515_v22 = vadd.f32 %v514_v20, %v513_v16  ;;  %v524_v23 = vadd.f32 %v523_v21, %v522_v17 }
 0x24b   : > { %v525_v24 = vmul.f32 0.03125, %v515_v22  ;;  %v526_v25 = vmul.f32 0.03125, %v524_v23 }
 0x24d   : > { %713 = vmatmul.f32.vlgmr.msrb.gmra.mxu1 %v525_v24  ;;  %733 = vmatmul.f32.vlgmr.msrb.gmra.mxu0 %v526_v25 }
 0x250   : > { %753 = vmatmul.f32.vlgmr.msrb.gmra.mxu2 %v497_v18  ;;  %773 = vmatmul.f32.vlgmr.msrb.gmra.mxu3 %v506_v19 }
 0x255   : > { %793 = vmatmul.f32.vlgmr.msra.gmra.mxu1 %v525_v24  ;;  %813 = vmatmul.f32.vlgmr.msra.gmra.mxu0 %v526_v25 }
 0x2ca   : > { %v714_v30 = vpop.f32.mrf.mxu1  ;;  %v734_v32 = vpop.f32.mrf.mxu0 }
 0x2cb   : > { %v674_v27 = vpop.f32.mrf.mxu2  ;;  %v694_v28 = vpop.f32.mrf.mxu3 }
 0x2cc   : > { %v675_v29 = vadd.f32 %v674_v27, %v656_v26 }
 0x2ce   : > { %v695_v31 = vadd.f32 %v694_v28, %v675_v29 }
 0x2d0   : > { %v715_v33 = vadd.f32 %v714_v30, %v695_v31 }
 0x2d2   : > { %v735_v34 = vadd.f32 %v734_v32, %v715_v33  ;;  %v794_v40 = vpop.f32.mrf.mxu1  ;;  %v814_v46 = vpop.f32.mrf.mxu0 }
 0x2d3   : > { %v754_v35 = vpop.f32.mrf.mxu2  ;;  %v774_v38 = vpop.f32.mrf.mxu3 }
 0x2d4   : > { %v955_v36 = vmul.f32 -1.442695, %v735_v34  ;;  %v755_v37 = vadd.f32 %v754_v35, %v656_v26 }
 0x2d6   : > { %993 = vpow2.f32 %v955_v36  ;;  %v775_v39 = vadd.f32 %v774_v38, %v755_v37 }
 0x2d8   : > { %v795_v41 = vadd.f32 %v794_v40, %v775_v39 }
 0x2da   : > { %v815_v47 = vadd.f32 %v814_v46, %v795_v41 }
 0x2dc   : > { %v994_v9 = vpop.eup %993  ;;  %v956_v10 = vmul.f32 -1.442695, %v815_v47 }
 0x2dd   : > { %v823_v2 = vadd.f32 1.0, %v994_v9 }
 0x2de   : > { %995 = vpow2.f32 %v956_v10 }
 0x2df   : > { %997 = vrcp.f32 %v823_v2  ;;  %v836_v52 = vand.u32 2147483648, %v823_v2  ;;  %v834_v54 = vand.u32 2147483647, %v823_v2  ;;  %vm830_vm12 = vweird.f32 %v823_v2 }
 0x2e1   : > { %v837_v57 = vor.u32 1.1754944e-38, %v836_v52  ;;  %vm835_vm14 = vcmp.eq.f32.partialorder %v834_v54, 8.507059e+37 }
 0x2e4   : > { %v996_v5 = vpop.eup %995 }
 0x2e5   : > { %v998_v7 = vpop.eup %997  ;;  %v824_v8 = vadd.f32 1.0, %v996_v5 }
 0x2e6   : > { %v826_v50 = vmul.f32 %v998_v7, %v823_v2  ;;  %vm831_vm11 = vweird.f32 %v998_v7 }
 0x2e7   : > { %999 = vrcp.f32 %v824_v8  ;;  %vm832_vm13 = vmor %vm830_vm12, %vm831_vm11  ;;  %v851_v6 = vand.u32 2147483648, %v824_v8  ;;  %v849_v13 = vand.u32 2147483647, %v824_v8  ;;  %vm845_vm0 = vweird.f32 %v824_v8 }
 0x2e8   : > { %v827_v51 = vsub.f32 1.0, %v826_v50 }
 0x2e9   : > { %v852_v15 = vor.u32 1.1754944e-38, %v851_v6  ;;  %vm850_vm2 = vcmp.eq.f32.partialorder %v849_v13, 8.507059e+37 }
 0x2ea   : > { %v828_v53 = vmul.f32 %v998_v7, %v827_v51 }
 0x2ec   : > { %v829_v55 = vadd.f32 %v998_v7, %v828_v53 }
 0x2ed   : > { %v1000_v56 = vpop.eup %999 }
 0x2ee   : > { %v833_v58 = vsel %vm832_vm13, %v998_v7, %v829_v55  ;;  %v841_v59 = vmul.f32 %v1000_v56, %v824_v8  ;;  %vm846_vm15 = vweird.f32 %v1000_v56 }
 0x2ef   : > { %v838_v60 = vsel %vm835_vm14, %v837_v57, %v833_v58  ;;  %vm847_vm1 = vmor %vm845_vm0, %vm846_vm15 }
 0x2f0   : > { %v855_v61 = vperm.slane %v838_v60, 0  ;;  %v842_v62 = vsub.f32 1.0, %v841_v59 }
 0x2f2   : > { %v857_v63 = vmul.f32 %v855_v61, %v1168_v42  ;;  %v859_v3 = vmul.f32 %v855_v61, %v1186_v0  ;;  %v861_v4 = vmul.f32 %v855_v61, %v1180_v48  ;;  %v863_v11 = vmul.f32 %v855_v61, %v1174_v44 }
 0x2f3   : > { %v843_v12 = vmul.f32 %v1000_v56, %v842_v62 }
 0x2f4   : > { %865 = vst [vmem:[%s296_s10] sm:$0xff] %v857_v63 }
 0x2f5   : > { %867 = vst [vmem:[%s296_s10 + $0x10] sm:$0xff] %v859_v3  ;;  %v844_v14 = vadd.f32 %v1000_v56, %v843_v12 }
 0x2f6   : > { %869 = vst [vmem:[%s296_s10 + $0x20] sm:$0xff] %v861_v4 }
 0x2f7   : > { %871 = vst [vmem:[%s296_s10 + $0x30] sm:$0xff] %v863_v11  ;;  %v848_v16 = vsel %vm847_vm1, %v1000_v56, %v844_v14 }
 0x2f8   : > { %v853_v42 = vsel %vm850_vm2, %v852_v15, %v848_v16 }
 0x2f9   : > { %v856_v0 = vperm.slane %v853_v42, 0 }
 0x2fb   : > { %v858_v48 = vmul.f32 %v856_v0, %v1171_v43  ;;  %v860_v17 = vmul.f32 %v856_v0, %v1189_v1  ;;  %v862_v44 = vmul.f32 %v856_v0, %v1183_v49  ;;  %v864_v18 = vmul.f32 %v856_v0, %v1177_v45 }
 0x2fd   : > { %866 = vst [vmem:[%s296_s10 + $0x8] sm:$0xff] %v858_v48 }
 0x2fe   : > { %868 = vst [vmem:[%s296_s10 + $0x18] sm:$0xff] %v860_v17 }
 0x2ff   : > { %870 = vst [vmem:[%s296_s10 + $0x28] sm:$0xff] %v862_v44 }
 0x300   : > { %872 = vst [vmem:[%s296_s10 + $0x38] sm:$0xff] %v864_v18 }
 0x301 PF: > { %s19_s26 = sadd.s32 1, %s1041_s26  }
 0x302   : > { %p16_p7 = scmp.ge.s32.totalorder %s19_s26, 4  }
 0x304   :  { %18 = sbr.rel (!%p16_p7) target bundleno = 3 (0x3), region = 83 }
 0x309   :  { %894 = vsyncpa [#allocation4], 1 }
 0x30a   :  { %896 = vsyncpa [#allocation4 + $0x1], 1 }

</bundles_post_ra>
